<compile_context>
chip_gen: v7x
topology: tpu7x:2x2x1
jax: 0.10.0
libtpu: 0.0.40
codegen_flags: <defaults>
</compile_context>

<pallas_src>
import functools

import jax
import jax.numpy as jnp
from jax.experimental import pallas as pl
from jax.experimental.pallas import tpu as pltpu


_BT = 512  # batch tile (lane width of every activation / the output)


# ----------------------------------------------------------------------------
# Kernel: one grid axis over 512-wide batch tiles; all flows fused inside.
# Everything is laid out with batch on the lane axis.
# ----------------------------------------------------------------------------
def _nf_kernel(a_ref, cond_ref,
               w1_ref, b1_ref, w2_ref, b2_ref, w3_ref, b3_ref,
               out_ref, *, n_flows):
    cond_t = cond_ref[...]                                            # (C, bt)

    # Fused conditioning MLP (transposed): C -> n*32 -> n*16 -> 2n, ReLU between.
    h1 = jnp.dot(w1_ref[...], cond_t, preferred_element_type=jnp.float32) + b1_ref[...]
    h1 = jnp.maximum(h1, 0.0)                                         # (n*32, bt)
    h2 = jnp.dot(w2_ref[...], h1, preferred_element_type=jnp.float32) + b2_ref[...]
    h2 = jnp.maximum(h2, 0.0)                                         # (n*16, bt)
    params = jnp.dot(w3_ref[...], h2, preferred_element_type=jnp.float32) + b3_ref[...]
    # params: (2n, bt), rows ordered [s_0 .. s_{n-1} | t_0 .. t_{n-1}], batch on lanes.

    s = params[:n_flows, :]                                           # (n, bt)
    t = params[n_flows:, :]                                           # (n, bt)
    inv_scale = jnp.exp(-s)                                           # one vectorized EUP stream
    ld = -jnp.sum(s, axis=0, keepdims=True)                           # (1, bt) XLU reduce; -log(exp(s)) == -s

    # Sequential affine recurrence on full-lane (1, bt) row vectors.
    z = a_ref[...]                                                    # (1, bt)
    for k in range(n_flows):                                          # tiny, unrolled
        z = (z - t[k:k + 1, :]) * inv_scale[k:k + 1, :]

    out_ref[0:1, :] = z                                               # lane-dense stores
    out_ref[1:2, :] = ld


# ----------------------------------------------------------------------------
# One-time parameter packing (hoisted out of the per-call forward).
# Produces fused, transposed, block-diagonal weights with batch-on-lanes layout.
# ----------------------------------------------------------------------------
def pack_flow_params(W1, b1, W2, b2, W3, b3):
    """W1:(n,C,32) b1:(n,1,32) W2:(n,32,16) b2:(n,1,16) W3:(n,16,2) b3:(n,1,2)."""
    n, C, h1 = W1.shape
    h2 = W2.shape[2]
    eye = jnp.eye(n, dtype=W1.dtype)

    # Layer 1: concatenate flow outputs along the row (sublane) dim -> (n*32, C).
    W1t = jnp.transpose(W1, (0, 2, 1)).reshape(n * h1, C)
    b1t = b1.reshape(n * h1, 1)
    # Layer 2: block-diagonal so flow k's hidden state only feeds flow k. (n*16, n*32)
    W2t = (eye[:, None, :, None] *
           jnp.transpose(W2, (0, 2, 1))[:, :, None, :]).reshape(n * h2, n * h1)
    b2t = b2.reshape(n * h2, 1)
    # Layer 3: block-diagonal, then reorder rows to [s_0..s_{n-1} | t_0..t_{n-1}].
    W3bd = (eye[:, None, :, None] *
            jnp.transpose(W3, (0, 2, 1))[:, :, None, :]).reshape(n * 2, n * h2)
    b3bd = b3.reshape(n * 2, 1)
    perm = jnp.concatenate([jnp.arange(n) * 2, jnp.arange(n) * 2 + 1])
    W3t = W3bd[perm, :]
    b3t = b3bd[perm, :]
    return (W1t, b1t, W2t, b2t, W3t, b3t)


# ----------------------------------------------------------------------------
# Jitted forward: pad batch, run the kernel over a parallel batch-tile grid,
# slice off padding.
# ----------------------------------------------------------------------------
@jax.jit
def conditional_nf_forward(a, condition, packed):
    """a: (B, 1) f32, condition: (B, C) f32, packed: output of pack_flow_params.

    Returns z: (B, 1), log_det_total: (B,).
    """
    W1t, b1t, W2t, b2t, W3t, b3t = packed
    n_flows = W3t.shape[0] // 2
    B, C = condition.shape
    bt = _BT

    # >= 2 grid steps so the "parallel" axis can shard across both v7x TCs.
    num_tiles = max(2, pl.cdiv(B, bt))
    B_pad = num_tiles * bt

    # Batch-on-lanes inputs, zero-padded (padded lanes are discarded below).
    a_row = jnp.zeros((1, B_pad), jnp.float32).at[0, :B].set(
        a.reshape(B).astype(jnp.float32))
    cond_t = jnp.zeros((C, B_pad), jnp.float32).at[:, :B].set(
        condition.T.astype(jnp.float32))

    out = pl.pallas_call(
        functools.partial(_nf_kernel, n_flows=n_flows),
        out_shape=jax.ShapeDtypeStruct((2, B_pad), jnp.float32),
        grid_spec=pltpu.PrefetchScalarGridSpec(
            num_scalar_prefetch=0,
            grid=(num_tiles,),
            in_specs=[
                pl.BlockSpec((1, bt), lambda i: (0, i)),      # a (batch on lanes)
                pl.BlockSpec((C, bt), lambda i: (0, i)),      # condition^T
                pl.BlockSpec(W1t.shape, lambda i: (0, 0)),    # fused weights, VMEM-resident
                pl.BlockSpec(b1t.shape, lambda i: (0, 0)),
                pl.BlockSpec(W2t.shape, lambda i: (0, 0)),
                pl.BlockSpec(b2t.shape, lambda i: (0, 0)),
                pl.BlockSpec(W3t.shape, lambda i: (0, 0)),
                pl.BlockSpec(b3t.shape, lambda i: (0, 0)),
            ],
            out_specs=pl.BlockSpec((2, bt), lambda i: (0, i)),  # row 0 = z, row 1 = log_det
        ),
        compiler_params=pltpu.CompilerParams(
            dimension_semantics=("parallel",)),                 # batch tiles shard across TCs
    )(a_row, cond_t, W1t, b1t, W2t, b2t, W3t, b3t)

    z = out[0, :B].reshape(B, 1)
    log_det_total = out[1, :B]
    return z, log_det_total


# ----------------------------------------------------------------------------
# Pure-JAX reference (mirrors the PyTorch forward exactly)
# ----------------------------------------------------------------------------
def reference_forward(a, condition, W1, b1, W2, b2, W3, b3):
    z = a
    log_det_total = jnp.zeros((a.shape[0],), jnp.float32)
    for k in range(W1.shape[0]):
        h1 = jnp.maximum(condition @ W1[k] + b1[k, 0], 0.0)
        h2 = jnp.maximum(h1 @ W2[k] + b2[k, 0], 0.0)
        params = h2 @ W3[k] + b3[k, 0]
        s = params[:, 0:1]
        t = params[:, 1:2]
        scale = jnp.exp(s)
        z = (z - t) / scale
        log_det_total = log_det_total + (-jnp.log(scale))[:, 0]
    return z, log_det_total


# ----------------------------------------------------------------------------
# Deterministic parameter init (nn.Linear-style uniform(-1/sqrt(fan_in), ..))
# ----------------------------------------------------------------------------
def init_params(key, n_flows, condition_dim):
    def linear(key, fan_in, fan_out):
        kw, kb = jax.random.split(key)
        bound = 1.0 / jnp.sqrt(fan_in)
        w = jax.random.uniform(kw, (fan_in, fan_out), jnp.float32, -bound, bound)
        b = jax.random.uniform(kb, (1, fan_out), jnp.float32, -bound, bound)
        return w, b

    W1, B1, W2, B2, W3, B3 = [], [], [], [], [], []
    for _ in range(n_flows):
        k1, k2, k3, key = jax.random.split(key, 4)
        w1, b1 = linear(k1, condition_dim, 32)
        w2, b2 = linear(k2, 32, 16)
        w3, b3 = linear(k3, 16, 2)
        W1.append(w1); B1.append(b1)
        W2.append(w2); B2.append(b2)
        W3.append(w3); B3.append(b3)
    return (jnp.stack(W1), jnp.stack(B1),
            jnp.stack(W2), jnp.stack(B2),
            jnp.stack(W3), jnp.stack(B3))


if __name__ == "__main__":
    batch = 8
    condition_dim = 8
    n_flows = 4
    latent_dim = 1  # a is (B, 1) as in the PyTorch usage

    key = jax.random.PRNGKey(0)
    ka, kc, kp = jax.random.split(key, 3)
    a = jax.random.normal(ka, (batch, latent_dim), jnp.float32)
    condition = jax.random.normal(kc, (batch, condition_dim), jnp.float32)
    W1, b1, W2, b2, W3, b3 = init_params(kp, n_flows, condition_dim)

    # One-time weight packing (hoisted out of the per-call forward path).
    packed = jax.tree_util.tree_map(jax.block_until_ready,
                                    pack_flow_params(W1, b1, W2, b2, W3, b3))

    z, log_det = conditional_nf_forward(a, condition, packed)
    jax.block_until_ready((z, log_det))

    z_ref, ld_ref = reference_forward(a, condition, W1, b1, W2, b2, W3, b3)
    assert jnp.allclose(z, z_ref, atol=1e-5, rtol=1e-5), "z mismatch"
    assert jnp.allclose(log_det, ld_ref, atol=1e-5, rtol=1e-5), "log_det mismatch"

    print("KERNEL_OK")
</pallas_src>

<mosaic_0001>
module attributes {stable_mosaic.version = 11 : i64} {
  func.func @_nf_kernel(%arg0: i32, %arg1: memref<1x512xf32, #tpu.memory_space<vmem>>, %arg2: memref<8x512xf32, #tpu.memory_space<vmem>>, %arg3: memref<128x8xf32, #tpu.memory_space<vmem>>, %arg4: memref<128x1xf32, #tpu.memory_space<vmem>>, %arg5: memref<64x128xf32, #tpu.memory_space<vmem>>, %arg6: memref<64x1xf32, #tpu.memory_space<vmem>>, %arg7: memref<8x64xf32, #tpu.memory_space<vmem>>, %arg8: memref<8x1xf32, #tpu.memory_space<vmem>>, %arg9: memref<2x512xf32, #tpu.memory_space<vmem>>) attributes {dimension_semantics = [#tpu.dimension_semantics<parallel>], iteration_bounds = array<i64: 2>, scalar_prefetch = 0 : i64, scratch_operands = 0 : i64, tpu.core_type = #tpu.core_type<tc>, window_params = [{transform_indices = @transform_0, window_bounds = array<i64: 1, 512>}, {transform_indices = @transform_1, window_bounds = array<i64: 8, 512>}, {pipeline_mode = #tpu.pipeline_mode<synchronous>, transform_indices = @transform_2, window_bounds = array<i64: 128, 8>}, {pipeline_mode = #tpu.pipeline_mode<synchronous>, transform_indices = @transform_3, window_bounds = array<i64: 128, 1>}, {pipeline_mode = #tpu.pipeline_mode<synchronous>, transform_indices = @transform_4, window_bounds = array<i64: 64, 128>}, {pipeline_mode = #tpu.pipeline_mode<synchronous>, transform_indices = @transform_5, window_bounds = array<i64: 64, 1>}, {pipeline_mode = #tpu.pipeline_mode<synchronous>, transform_indices = @transform_6, window_bounds = array<i64: 8, 64>}, {pipeline_mode = #tpu.pipeline_mode<synchronous>, transform_indices = @transform_7, window_bounds = array<i64: 8, 1>}, {transform_indices = @transform_8, window_bounds = array<i64: 2, 512>}]} {
    %c0 = arith.constant 0 : index
    %c0_0 = arith.constant 0 : index
    %0 = vector.load %arg2[%c0, %c0_0] : memref<8x512xf32, #tpu.memory_space<vmem>>, vector<8x512xf32>
    %c0_1 = arith.constant 0 : index
    %c0_2 = arith.constant 0 : index
    %1 = vector.load %arg3[%c0_1, %c0_2] : memref<128x8xf32, #tpu.memory_space<vmem>>, vector<128x8xf32>
    %cst = arith.constant dense<0.000000e+00> : vector<128x512xf32>
    %2 = tpu.matmul %1, %0, %cst {dimension_numbers = #tpu.dot_dimension_numbers<[1], [0], [0], [1], [0, 0, 1, 1], [], []>} : vector<128x8xf32>, vector<8x512xf32>, vector<128x512xf32> -> vector<128x512xf32>
    %c0_3 = arith.constant 0 : index
    %c0_4 = arith.constant 0 : index
    %3 = vector.load %arg4[%c0_3, %c0_4] : memref<128x1xf32, #tpu.memory_space<vmem>>, vector<128x1xf32>
    %4 = vector.broadcast %3 : vector<128x1xf32> to vector<128x512xf32>
    %5 = arith.addf %2, %4 : vector<128x512xf32>
    %cst_5 = arith.constant 0.000000e+00 : f32
    %6 = vector.broadcast %cst_5 : f32 to vector<128x512xf32>
    %7 = arith.maximumf %5, %6 : vector<128x512xf32>
    %c0_6 = arith.constant 0 : index
    %c0_7 = arith.constant 0 : index
    %8 = vector.load %arg5[%c0_6, %c0_7] : memref<64x128xf32, #tpu.memory_space<vmem>>, vector<64x128xf32>
    %cst_8 = arith.constant dense<0.000000e+00> : vector<64x512xf32>
    %9 = tpu.matmul %8, %7, %cst_8 {dimension_numbers = #tpu.dot_dimension_numbers<[1], [0], [0], [1], [0, 0, 1, 1], [], []>} : vector<64x128xf32>, vector<128x512xf32>, vector<64x512xf32> -> vector<64x512xf32>
    %c0_9 = arith.constant 0 : index
    %c0_10 = arith.constant 0 : index
    %10 = vector.load %arg6[%c0_9, %c0_10] : memref<64x1xf32, #tpu.memory_space<vmem>>, vector<64x1xf32>
    %11 = vector.broadcast %10 : vector<64x1xf32> to vector<64x512xf32>
    %12 = arith.addf %9, %11 : vector<64x512xf32>
    %cst_11 = arith.constant 0.000000e+00 : f32
    %13 = vector.broadcast %cst_11 : f32 to vector<64x512xf32>
    %14 = arith.maximumf %12, %13 : vector<64x512xf32>
    %c0_12 = arith.constant 0 : index
    %c0_13 = arith.constant 0 : index
    %15 = vector.load %arg7[%c0_12, %c0_13] : memref<8x64xf32, #tpu.memory_space<vmem>>, vector<8x64xf32>
    %cst_14 = arith.constant dense<0.000000e+00> : vector<8x512xf32>
    %16 = tpu.matmul %15, %14, %cst_14 {dimension_numbers = #tpu.dot_dimension_numbers<[1], [0], [0], [1], [0, 0, 1, 1], [], []>} : vector<8x64xf32>, vector<64x512xf32>, vector<8x512xf32> -> vector<8x512xf32>
    %c0_15 = arith.constant 0 : index
    %c0_16 = arith.constant 0 : index
    %17 = vector.load %arg8[%c0_15, %c0_16] : memref<8x1xf32, #tpu.memory_space<vmem>>, vector<8x1xf32>
    %18 = vector.broadcast %17 : vector<8x1xf32> to vector<8x512xf32>
    %19 = arith.addf %16, %18 : vector<8x512xf32>
    %20 = vector.extract_strided_slice %19 {offsets = [0, 0], sizes = [4, 512], strides = [1, 1]} : vector<8x512xf32> to vector<4x512xf32>
    %21 = vector.extract_strided_slice %19 {offsets = [4, 0], sizes = [4, 512], strides = [1, 1]} : vector<8x512xf32> to vector<4x512xf32>
    %cst_17 = arith.constant 0.000000e+00 : f32
    %22 = vector.broadcast %cst_17 : f32 to vector<4x512xf32>
    %23 = arith.subf %22, %20 : vector<4x512xf32>
    %24 = math.exp %23 : vector<4x512xf32>
    %cst_18 = arith.constant dense<0.000000e+00> : vector<512xf32>
    %25 = vector.multi_reduction <add>, %20, %cst_18 [0] : vector<4x512xf32> to vector<512xf32>
    %26 = vector.shape_cast %25 : vector<512xf32> to vector<1x512xf32>
    %cst_19 = arith.constant 0.000000e+00 : f32
    %27 = vector.broadcast %cst_19 : f32 to vector<1x512xf32>
    %28 = arith.subf %27, %26 : vector<1x512xf32>
    %c0_20 = arith.constant 0 : index
    %c0_21 = arith.constant 0 : index
    %29 = vector.load %arg1[%c0_20, %c0_21] : memref<1x512xf32, #tpu.memory_space<vmem>>, vector<1x512xf32>
    %30 = vector.extract_strided_slice %21 {offsets = [0, 0], sizes = [1, 512], strides = [1, 1]} : vector<4x512xf32> to vector<1x512xf32>
    %31 = arith.subf %29, %30 : vector<1x512xf32>
    %32 = vector.extract_strided_slice %24 {offsets = [0, 0], sizes = [1, 512], strides = [1, 1]} : vector<4x512xf32> to vector<1x512xf32>
    %33 = arith.mulf %31, %32 : vector<1x512xf32>
    %34 = vector.extract_strided_slice %21 {offsets = [1, 0], sizes = [1, 512], strides = [1, 1]} : vector<4x512xf32> to vector<1x512xf32>
    %35 = arith.subf %33, %34 : vector<1x512xf32>
    %36 = vector.extract_strided_slice %24 {offsets = [1, 0], sizes = [1, 512], strides = [1, 1]} : vector<4x512xf32> to vector<1x512xf32>
    %37 = arith.mulf %35, %36 : vector<1x512xf32>
    %38 = vector.extract_strided_slice %21 {offsets = [2, 0], sizes = [1, 512], strides = [1, 1]} : vector<4x512xf32> to vector<1x512xf32>
    %39 = arith.subf %37, %38 : vector<1x512xf32>
    %40 = vector.extract_strided_slice %24 {offsets = [2, 0], sizes = [1, 512], strides = [1, 1]} : vector<4x512xf32> to vector<1x512xf32>
    %41 = arith.mulf %39, %40 : vector<1x512xf32>
    %42 = vector.extract_strided_slice %21 {offsets = [3, 0], sizes = [1, 512], strides = [1, 1]} : vector<4x512xf32> to vector<1x512xf32>
    %43 = arith.subf %41, %42 : vector<1x512xf32>
    %44 = vector.extract_strided_slice %24 {offsets = [3, 0], sizes = [1, 512], strides = [1, 1]} : vector<4x512xf32> to vector<1x512xf32>
    %45 = arith.mulf %43, %44 : vector<1x512xf32>
    %c0_22 = arith.constant 0 : index
    %c0_23 = arith.constant 0 : index
    %46 = vector.load %arg9[%c0_22, %c0_23] : memref<2x512xf32, #tpu.memory_space<vmem>>, vector<1x512xf32>
    tpu.vector_store %arg9[%c0_22, %c0_23], %45 {strides = array<i32>} : memref<2x512xf32, #tpu.memory_space<vmem>>, vector<1x512xf32>,
    %c1 = arith.constant 1 : index
    %c0_24 = arith.constant 0 : index
    %47 = vector.load %arg9[%c1, %c0_24] : memref<2x512xf32, #tpu.memory_space<vmem>>, vector<1x512xf32>
    tpu.vector_store %arg9[%c1, %c0_24], %28 {strides = array<i32>} : memref<2x512xf32, #tpu.memory_space<vmem>>, vector<1x512xf32>,
    return
  }
  func.func @transform_0(%arg0: i32) -> (i32, i32) {
    %c0_i32 = arith.constant 0 : i32
    %c0_i32_0 = arith.constant 0 : i32
    return %c0_i32, %arg0 : i32, i32
  }
  func.func @transform_1(%arg0: i32) -> (i32, i32) {
    %c0_i32 = arith.constant 0 : i32
    %c0_i32_0 = arith.constant 0 : i32
    return %c0_i32, %arg0 : i32, i32
  }
  func.func @transform_2(%arg0: i32) -> (i32, i32) {
    %c0_i32 = arith.constant 0 : i32
    %c0_i32_0 = arith.constant 0 : i32
    %c0_i32_1 = arith.constant 0 : i32
    return %c0_i32, %c0_i32_0 : i32, i32
  }
  func.func @transform_3(%arg0: i32) -> (i32, i32) {
    %c0_i32 = arith.constant 0 : i32
    %c0_i32_0 = arith.constant 0 : i32
    %c0_i32_1 = arith.constant 0 : i32
    return %c0_i32, %c0_i32_0 : i32, i32
  }
  func.func @transform_4(%arg0: i32) -> (i32, i32) {
    %c0_i32 = arith.constant 0 : i32
    %c0_i32_0 = arith.constant 0 : i32
    %c0_i32_1 = arith.constant 0 : i32
    return %c0_i32, %c0_i32_0 : i32, i32
  }
  func.func @transform_5(%arg0: i32) -> (i32, i32) {
    %c0_i32 = arith.constant 0 : i32
    %c0_i32_0 = arith.constant 0 : i32
    %c0_i32_1 = arith.constant 0 : i32
    return %c0_i32, %c0_i32_0 : i32, i32
  }
  func.func @transform_6(%arg0: i32) -> (i32, i32) {
    %c0_i32 = arith.constant 0 : i32
    %c0_i32_0 = arith.constant 0 : i32
    %c0_i32_1 = arith.constant 0 : i32
    return %c0_i32, %c0_i32_0 : i32, i32
  }
  func.func @transform_7(%arg0: i32) -> (i32, i32) {
    %c0_i32 = arith.constant 0 : i32
    %c0_i32_0 = arith.constant 0 : i32
    %c0_i32_1 = arith.constant 0 : i32
    return %c0_i32, %c0_i32_0 : i32, i32
  }
  func.func @transform_8(%arg0: i32) -> (i32, i32) {
    %c0_i32 = arith.constant 0 : i32
    %c0_i32_0 = arith.constant 0 : i32
    return %c0_i32, %arg0 : i32, i32
  }
}

</mosaic_0001>

<bundles_post_ra>
// kernel: conditional_nf_forward.1
= control target key start
LH: loop header
LB: loop body
LE: loop exit
PB: predicated region body
PF: predicated region fallthrough
CT: control target
= control target key end

     0   :  { %s1805_s27 = smov 0   ;;  %s2089_s0 = inlined_call_operand.vmem [shape: f32[1,1024], index: 0, kind: input, shape index: {}]   ;;  %s2090_s1 = inlined_call_operand.vmem [shape: f32[8,1024], index: 1, kind: input, shape index: {}]   ;;  %s2091_s2 = inlined_call_operand.vmem [shape: f32[128,8], index: 2, kind: input, shape index: {}]   ;;  %s2092_s3 = inlined_call_operand.vmem [shape: f32[128,1], index: 3, kind: input, shape index: {}]   ;;  %s2093_s4 = inlined_call_operand.vmem [shape: f32[64,128], index: 4, kind: input, shape index: {}]   ;;  %s2094_s5 = inlined_call_operand.vmem [shape: f32[64,1], index: 5, kind: input, shape index: {}]   ;;  %s2095_s6 = inlined_call_operand.vmem [shape: f32[8,64], index: 6, kind: input, shape index: {}]   ;;  %s2096_s7 = inlined_call_operand.vmem [shape: f32[8,1], index: 7, kind: input, shape index: {}]   ;;  %s2097_s8 = inlined_call_operand.vmem [shape: f32[2,1024], index: 8, kind: output, shape index: {}]  }
   0x1 LB: > { %s1585_s28 = sadd.s32 4294967295, %s1755_s27   ;;  %p1589_p0 = scmp.ge.s32.totalorder %s1755_s27, 1  ;;  %s1755_s27 = sphi %s1805_s27, %s18_s27  }
   0x2   : > { %p273_p1 = scmp.lt.s32.totalorder %s1755_s27, 3 }
   0x4   : > { %p274_p2 = pnand %p1589_p0, %p273_p1 }
   0x5   : > { %s1590_s29 = sshll.u32 (!%p274_p2), %s1585_s28, 2  ;;  %v1757_v0 = vmov (!%p274_p2), 0.0   ;;  %v1758_v1 = vmov (!%p274_p2), 0   ;;  %v348_v2 = vld [vmem:[%s2092_s3] sm:$0xff] (!%p274_p2)  ;;  %v350_v3 = vld [vmem:[%s2092_s3 + $0x10] sm:$0xff] (!%p274_p2)  ;;  %vm444_vm0 = vcmask (!%p274_p2), 64512  }
   0x6   : > { %277 = sbr.rel (%p274_p2) target bundleno = 808 (0x328), region = 52  ;;  %p312_p3 = scmp.lt.s32.totalorder (!%p274_p2), %s1590_s29, 7  ;;  %557 = vmatprep.mubr.f32.mxu0 (!%p274_p2), %v1757_v0  ;;  %718 = vmatprep.mubr.f32.mxu1 (!%p274_p2), %v1757_v0  ;;  %v332_v4 = vld [vmem:[%s2091_s2] sm:$0xff] (!%p274_p2)  ;;  %v349_v9 = vld [vmem:[%s2092_s3 + $0x8] sm:$0xff] (!%p274_p2)  ;;  %v351_v10 = vld [vmem:[%s2092_s3 + $0x18] sm:$0xff] (!%p274_p2)  ;;  %vm1200_vm1 = vcmask (!%p274_p2), 523264  }
   0x7   : > { %1739 = vset.pattern.permute.xlu0 (!%p274_p2), %v1758_v1  ;;  %1740 = vset.pattern.permute.xlu1 (!%p274_p2), %v1758_v1  ;;  %v333_v11 = vld [vmem:[%s2091_s2 + $0x8] sm:$0xff] (!%p274_p2)  ;;  %v352_v12 = vld [vmem:[%s2092_s3 + $0x20] sm:$0xff] (!%p274_p2)  ;;  %v334_v14 = vld [vmem:[%s2091_s2 + $0x10] sm:$0xff] (!%p274_p2)  ;;  %vm1358_vm2 = vcmask (!%p274_p2), 1043456  }
   0x8   : > { %366 = vperm.xlu0 (!%p274_p2), %1739, %v348_v2   ;;  %376 = vperm.xlu1 (!%p274_p2), %1740, %v350_v3   ;;  %v353_v13 = vld [vmem:[%s2092_s3 + $0x28] sm:$0xff] (!%p274_p2)  ;;  %v354_v15 = vld [vmem:[%s2092_s3 + $0x30] sm:$0xff] (!%p274_p2)  ;;  %v355_v16 = vld [vmem:[%s2092_s3 + $0x38] sm:$0xff] (!%p274_p2) }
   0x9   : > { %v335_v17 = vld [vmem:[%s2091_s2 + $0x18] sm:$0xff] (!%p274_p2)  ;;  %v356_v18 = vld [vmem:[%s2092_s3 + $0x40] sm:$0xff] (!%p274_p2)  ;;  %v357_v19 = vld [vmem:[%s2092_s3 + $0x48] sm:$0xff] (!%p274_p2) }
   0xa   : > { %v336_v20 = vld [vmem:[%s2091_s2 + $0x20] sm:$0xff] (!%p274_p2)  ;;  %v358_v21 = vld [vmem:[%s2092_s3 + $0x50] sm:$0xff] (!%p274_p2)  ;;  %v359_v22 = vld [vmem:[%s2092_s3 + $0x58] sm:$0xff] (!%p274_p2) }
   0xb   : > { %v337_v23 = vld [vmem:[%s2091_s2 + $0x28] sm:$0xff] (!%p274_p2)  ;;  %v360_v24 = vld [vmem:[%s2092_s3 + $0x60] sm:$0xff] (!%p274_p2)  ;;  %v338_v26 = vld [vmem:[%s2091_s2 + $0x30] sm:$0xff] (!%p274_p2) }
   0xc   : > { %371 = vperm.xlu0 (!%p274_p2), %1739, %v349_v9   ;;  %381 = vperm.xlu1 (!%p274_p2), %1740, %v351_v10   ;;  %v361_v25 = vld [vmem:[%s2092_s3 + $0x68] sm:$0xff] (!%p274_p2)  ;;  %v362_v27 = vld [vmem:[%s2092_s3 + $0x70] sm:$0xff] (!%p274_p2)  ;;  %v363_v28 = vld [vmem:[%s2092_s3 + $0x78] sm:$0xff] (!%p274_p2) }
   0xd   : > { %s2101_s29 = smov (!%p312_p3, %s1590_s29), 7  ;;  %v339_v29 = vld [vmem:[%s2091_s2 + $0x38] sm:$0xff]  ;;  %v887_v30 = vld [vmem:[%s2094_s5] sm:$0xff]  ;;  %v888_v31 = vld [vmem:[%s2094_s5 + $0x8] sm:$0xff] }
   0xe   : > { %s1592_s10 = sshll.u32 %s2101_s29, 3  ;;  %v340_v32 = vld [vmem:[%s2091_s2 + $0x40] sm:$0xff]  ;;  %v889_v33 = vld [vmem:[%s2094_s5 + $0x10] sm:$0xff]  ;;  %v890_v34 = vld [vmem:[%s2094_s5 + $0x18] sm:$0xff]  ;;  %s314_s14 = scalar_lea.vmem %s2089_s0, %s2101_s29 }
   0xf   : > { %s320_s15 = scalar_lea.vmem %s2090_s1, %s1592_s10  ;;  %v341_v35 = vld [vmem:[%s2091_s2 + $0x48] sm:$0xff]  ;;  %v891_v36 = vld [vmem:[%s2094_s5 + $0x20] sm:$0xff]  ;;  %v342_v38 = vld [vmem:[%s2091_s2 + $0x50] sm:$0xff] }
  0x10   : > { %v329_v5 = vld [vmem:[%s320_s15 + $0x8] sm:$0xff]  ;;  %v331_v6 = vld [vmem:[%s320_s15 + $0x18] sm:$0xff]  ;;  %v328_v7 = vld [vmem:[%s320_s15] sm:$0xff]  ;;  %386 = vperm.xlu0 %1739, %v352_v12   ;;  %391 = vperm.xlu1 %1740, %v353_v13  }
  0x11   : > { %493 = vmatprep.subr.mxu0 %v329_v5  ;;  %654 = vmatprep.subr.mxu1 %v331_v6  ;;  %v330_v8 = vld [vmem:[%s320_s15 + $0x10] sm:$0xff]  ;;  %v892_v37 = vld [vmem:[%s2094_s5 + $0x28] sm:$0xff]  ;;  %v894_v40 = vld [vmem:[%s2094_s5 + $0x38] sm:$0xff]  ;;  %s1594_s15 = sshll.u32 %s2101_s29, 1 }
  0x12   : > { %494 = vmatpush1.msra.mxu0 %v328_v7  ;;  %655 = vmatpush1.msra.mxu1 %v330_v8  ;;  %v893_v39 = vld [vmem:[%s2094_s5 + $0x30] sm:$0xff]  ;;  %v343_v41 = vld [vmem:[%s2091_s2 + $0x58] sm:$0xff]  ;;  %v1194_v42 = vld [vmem:[%s2096_s7] sm:$0xff]  ;;  %s326_s18 = scalar_lea.vmem %s2097_s8, %s1594_s15 }
  0x13   : > { %1595 = vmatmul.mubr.msk.f32.vlgmr.msra.gmra.mrb[0].mxu0 %vm444_vm0, %v332_v4  ;;  %1611 = vmatmul.mubr.msk.f32.vlgmr.msra.gmra.mrb[0].mxu1 %vm444_vm0, %v332_v4  ;;  %v344_v43 = vld [vmem:[%s2091_s2 + $0x60] sm:$0xff]  ;;  %v345_v44 = vld [vmem:[%s2091_s2 + $0x68] sm:$0xff]  ;;  %v346_v45 = vld [vmem:[%s2091_s2 + $0x70] sm:$0xff] }
  0x14   : > { %563 = vmatprep.mubr.f32.mxu0 %v1757_v0  ;;  %724 = vmatprep.mubr.f32.mxu1 %v1757_v0  ;;  %v347_v46 = vld [vmem:[%s2091_s2 + $0x78] sm:$0xff] }
  0x15   : > { %396 = vperm.xlu0 %1739, %v354_v15   ;;  %401 = vperm.xlu1 %1740, %v355_v16  }
  0x17   : > { %1596 = vmatmul.mubr.msk.f32.gmra.mrb[2].mxu0 %vm444_vm0, %v333_v11  ;;  %1612 = vmatmul.mubr.msk.f32.gmra.mrb[2].mxu1 %vm444_vm0, %v333_v11 }
  0x18   : > { %569 = vmatprep.mubr.f32.mxu0 %v1757_v0  ;;  %730 = vmatprep.mubr.f32.mxu1 %v1757_v0 }
  0x19   : > { %406 = vperm.xlu0 %1739, %v356_v18   ;;  %411 = vperm.xlu1 %1740, %v357_v19  }
  0x1b   : > { %1597 = vmatmul.mubr.msk.f32.gmra.mrb[4].mxu0 %vm444_vm0, %v334_v14  ;;  %1613 = vmatmul.mubr.msk.f32.gmra.mrb[4].mxu1 %vm444_vm0, %v334_v14 }
  0x1c   : > { %575 = vmatprep.mubr.f32.mxu0 %v1757_v0  ;;  %736 = vmatprep.mubr.f32.mxu1 %v1757_v0 }
  0x1d   : > { %416 = vperm.xlu0 %1739, %v358_v21   ;;  %421 = vperm.xlu1 %1740, %v359_v22  }
  0x1f   : > { %1598 = vmatmul.mubr.msk.f32.gmra.mrb[6].mxu0 %vm444_vm0, %v335_v17  ;;  %1614 = vmatmul.mubr.msk.f32.gmra.mrb[6].mxu1 %vm444_vm0, %v335_v17 }
  0x20   : > { %581 = vmatprep.mubr.f32.mxu0 %v1757_v0  ;;  %742 = vmatprep.mubr.f32.mxu1 %v1757_v0 }
  0x21   : > { %426 = vperm.xlu0 %1739, %v360_v24   ;;  %431 = vperm.xlu1 %1740, %v361_v25  }
  0x23   : > { %1599 = vmatmul.mubr.msk.f32.gmra.mrb[8].mxu0 %vm444_vm0, %v336_v20  ;;  %1615 = vmatmul.mubr.msk.f32.gmra.mrb[8].mxu1 %vm444_vm0, %v336_v20 }
  0x24   : > { %587 = vmatprep.mubr.f32.mxu0 %v1757_v0  ;;  %748 = vmatprep.mubr.f32.mxu1 %v1757_v0 }
  0x25   : > { %436 = vperm.xlu0 %1739, %v362_v27   ;;  %441 = vperm.xlu1 %1740, %v363_v28  }
  0x27   : > { %1600 = vmatmul.mubr.msk.f32.gmra.mrb[10].mxu0 %vm444_vm0, %v337_v23  ;;  %1616 = vmatmul.mubr.msk.f32.gmra.mrb[10].mxu1 %vm444_vm0, %v337_v23 }
  0x28   : > { %593 = vmatprep.mubr.f32.mxu0 %v1757_v0  ;;  %754 = vmatprep.mubr.f32.mxu1 %v1757_v0 }
  0x29   : > { %897 = vperm.xlu0 %1739, %v887_v30   ;;  %902 = vperm.xlu1 %1740, %v888_v31  }
  0x2b   : > { %1601 = vmatmul.mubr.msk.f32.gmra.mrb[12].mxu0 %vm444_vm0, %v338_v26  ;;  %1617 = vmatmul.mubr.msk.f32.gmra.mrb[12].mxu1 %vm444_vm0, %v338_v26 }
  0x2c   : > { %599 = vmatprep.mubr.f32.mxu0 %v1757_v0  ;;  %760 = vmatprep.mubr.f32.mxu1 %v1757_v0 }
  0x2d   : > { %907 = vperm.xlu0 %1739, %v889_v33   ;;  %912 = vperm.xlu1 %1740, %v890_v34  }
  0x2f   : > { %1602 = vmatmul.mubr.msk.f32.gmra.mrb[14].mxu0 %vm444_vm0, %v339_v29  ;;  %1618 = vmatmul.mubr.msk.f32.gmra.mrb[14].mxu1 %vm444_vm0, %v339_v29 }
  0x30   : > { %605 = vmatprep.mubr.f32.mxu0 %v1757_v0  ;;  %766 = vmatprep.mubr.f32.mxu1 %v1757_v0 }
  0x31   : > { %917 = vperm.xlu0 %1739, %v891_v36   ;;  %922 = vperm.xlu1 %1740, %v892_v37  }
  0x33   : > { %1603 = vmatmul.mubr.msk.f32.gmra.mrb[16].mxu0 %vm444_vm0, %v340_v32  ;;  %1619 = vmatmul.mubr.msk.f32.gmra.mrb[16].mxu1 %vm444_vm0, %v340_v32 }
  0x34   : > { %611 = vmatprep.mubr.f32.mxu0 %v1757_v0  ;;  %772 = vmatprep.mubr.f32.mxu1 %v1757_v0 }
  0x35   : > { %927 = vperm.xlu0 %1739, %v893_v39   ;;  %932 = vperm.xlu1 %1740, %v894_v40  }
  0x37   : > { %1604 = vmatmul.mubr.msk.f32.gmra.mrb[18].mxu0 %vm444_vm0, %v341_v35  ;;  %1620 = vmatmul.mubr.msk.f32.gmra.mrb[18].mxu1 %vm444_vm0, %v341_v35 }
  0x38   : > { %617 = vmatprep.mubr.f32.mxu0 %v1757_v0  ;;  %778 = vmatprep.mubr.f32.mxu1 %v1757_v0 }
  0x39   : > { %1197 = vperm.xlu0 %1739, %v1194_v42  }
  0x3b   : > { %1605 = vmatmul.mubr.msk.f32.gmra.mrb[20].mxu0 %vm444_vm0, %v342_v38  ;;  %1621 = vmatmul.mubr.msk.f32.gmra.mrb[20].mxu1 %vm444_vm0, %v342_v38 }
  0x3c   : > { %623 = vmatprep.mubr.f32.mxu0 %v1757_v0  ;;  %784 = vmatprep.mubr.f32.mxu1 %v1757_v0 }
  0x3f   : > { %1606 = vmatmul.mubr.msk.f32.gmra.mrb[22].mxu0 %vm444_vm0, %v343_v41  ;;  %1622 = vmatmul.mubr.msk.f32.gmra.mrb[22].mxu1 %vm444_vm0, %v343_v41 }
  0x40   : > { %629 = vmatprep.mubr.f32.mxu0 %v1757_v0  ;;  %790 = vmatprep.mubr.f32.mxu1 %v1757_v0 }
  0x43   : > { %1607 = vmatmul.mubr.msk.f32.gmra.mrb[24].mxu0 %vm444_vm0, %v344_v43  ;;  %1623 = vmatmul.mubr.msk.f32.gmra.mrb[24].mxu1 %vm444_vm0, %v344_v43 }
  0x44   : > { %635 = vmatprep.mubr.f32.mxu0 %v1757_v0  ;;  %796 = vmatprep.mubr.f32.mxu1 %v1757_v0 }
  0x47   : > { %1608 = vmatmul.mubr.msk.f32.gmra.mrb[26].mxu0 %vm444_vm0, %v345_v44  ;;  %1624 = vmatmul.mubr.msk.f32.gmra.mrb[26].mxu1 %vm444_vm0, %v345_v44 }
  0x48   : > { %641 = vmatprep.mubr.f32.mxu0 %v1757_v0  ;;  %802 = vmatprep.mubr.f32.mxu1 %v1757_v0 }
  0x4b   : > { %1609 = vmatmul.mubr.msk.f32.gmra.mrb[28].mxu0 %vm444_vm0, %v346_v45  ;;  %1625 = vmatmul.mubr.msk.f32.gmra.mrb[28].mxu1 %vm444_vm0, %v346_v45 }
  0x4c   : > { %647 = vmatprep.mubr.f32.mxu0 %v1757_v0  ;;  %808 = vmatprep.mubr.f32.mxu1 %v1757_v0 }
  0x4f   : > { %1610 = vmatmul.mubr.msk.f32.gmra.mrb[30].mxu0 %vm444_vm0, %v347_v46  ;;  %1626 = vmatmul.mubr.msk.f32.gmra.mrb[30].mxu1 %vm444_vm0, %v347_v46 }
  0x50   : > { %999 = vmatprep.mubr.f32.mxu0 %v1757_v0  ;;  %1112 = vmatprep.mubr.f32.mxu1 %v1757_v0 }
  0x87   : > { %v367_v47 = vpop.permute.xlu0 %366  ;;  %v377_v53 = vpop.permute.xlu1 %376 }
  0x8b   : > { %v372_v52 = vpop.permute.xlu0 %371  ;;  %v382_v19 = vpop.permute.xlu1 %381 }
  0x8f   : > { %v387_v46 = vpop.permute.xlu0 %386 }
  0xe6   : > { %v559_v48 = vpop.f32.mrb[0].mxu0  ;;  %v720_v49 = vpop.f32.mrb[0].mxu1 }
  0xe7   : > { %v561_v50 = vpop.f32.mrb[1].mxu0  ;;  %v722_v51 = vpop.f32.mrb[1].mxu1  ;;  %v560_v54 = vadd.f32 %v559_v48, %v367_v47  ;;  %v721_v55 = vadd.f32 %v720_v49, %v367_v47 }
  0xe8   : > { %v562_v56 = vadd.f32 %v561_v50, %v367_v47  ;;  %v723_v57 = vadd.f32 %v722_v51, %v367_v47  ;;  %v392_v49 = vpop.permute.xlu1 %391 }
  0xe9   : > { %v815_v3 = vmax.f32 %v560_v54, 0.0  ;;  %v817_v4 = vmax.f32 %v721_v55, 0.0 }
  0xea   : > { %v565_v58 = vpop.f32.mrb[2].mxu0  ;;  %v726_v59 = vpop.f32.mrb[2].mxu1  ;;  %v816_v7 = vmax.f32 %v562_v56, 0.0  ;;  %v818_v8 = vmax.f32 %v723_v57, 0.0 }
  0xeb   : > { %v566_v60 = vadd.f32 %v565_v58, %v372_v52  ;;  %v727_v61 = vadd.f32 %v726_v59, %v372_v52  ;;  %v567_v62 = vpop.f32.mrb[3].mxu0  ;;  %v728_v63 = vpop.f32.mrb[3].mxu1 }
  0xec   : > { %v568_v1 = vadd.f32 %v567_v62, %v372_v52  ;;  %v729_v2 = vadd.f32 %v728_v63, %v372_v52 }
  0xed   : > { %v819_v5 = vmax.f32 %v566_v60, 0.0  ;;  %v821_v6 = vmax.f32 %v727_v61, 0.0 }
  0xee   : > { %v820_v9 = vmax.f32 %v568_v1, 0.0  ;;  %v822_v10 = vmax.f32 %v729_v2, 0.0  ;;  %v571_v11 = vpop.f32.mrb[4].mxu0  ;;  %v732_v12 = vpop.f32.mrb[4].mxu1 }
  0xef   : > { %v1634_v13 = vpack.c.bf16 %v819_v5, %v815_v3  ;;  %v1666_v14 = vpack.c.bf16 %v821_v6, %v817_v4  ;;  %v573_v15 = vpop.f32.mrb[5].mxu0  ;;  %v734_v16 = vpop.f32.mrb[5].mxu1  ;;  %v572_v20 = vadd.f32 %v571_v11, %v377_v53  ;;  %v733_v21 = vadd.f32 %v732_v12, %v377_v53 }
  0xf0   : > { %v1632_v17 = vpack.c.bf16 %v820_v9, %v816_v7  ;;  %v1664_v18 = vpack.c.bf16 %v822_v10, %v818_v8  ;;  %v574_v22 = vadd.f32 %v573_v15, %v377_v53  ;;  %v735_v23 = vadd.f32 %v734_v16, %v377_v53  ;;  %v402_v16 = vpop.permute.xlu1 %401 }
  0xf1   : > { %v823_v32 = vmax.f32 %v572_v20, 0.0  ;;  %v825_v33 = vmax.f32 %v733_v21, 0.0 }
  0xf2   : > { %v577_v24 = vpop.f32.mrb[6].mxu0  ;;  %v738_v25 = vpop.f32.mrb[6].mxu1  ;;  %1633 = vmatprep.subr.bf16.mxu0 %v1632_v17  ;;  %1665 = vmatprep.subr.bf16.mxu1 %v1664_v18  ;;  %v824_v36 = vmax.f32 %v574_v22, 0.0  ;;  %v826_v37 = vmax.f32 %v735_v23, 0.0 }
  0xf3   : > { %v578_v26 = vadd.f32 %v577_v24, %v382_v19  ;;  %v739_v27 = vadd.f32 %v738_v25, %v382_v19  ;;  %v579_v28 = vpop.f32.mrb[7].mxu0  ;;  %v740_v29 = vpop.f32.mrb[7].mxu1  ;;  %1635 = vmatpush1.bf16.msra.mxu0 %v1634_v13  ;;  %1667 = vmatpush1.bf16.msra.mxu1 %v1666_v14 }
  0xf4   : > { %v580_v30 = vadd.f32 %v579_v28, %v382_v19  ;;  %v741_v31 = vadd.f32 %v740_v29, %v382_v19  ;;  %v397_v13 = vpop.permute.xlu0 %396 }
  0xf5   : > { %v827_v34 = vmax.f32 %v578_v26, 0.0  ;;  %v829_v35 = vmax.f32 %v739_v27, 0.0 }
  0xf6   : > { %v828_v38 = vmax.f32 %v580_v30, 0.0  ;;  %v830_v39 = vmax.f32 %v741_v31, 0.0  ;;  %v583_v40 = vpop.f32.mrb[8].mxu0  ;;  %v744_v41 = vpop.f32.mrb[8].mxu1 }
  0xf7   : > { %v1638_v42 = vpack.c.bf16 %v827_v34, %v823_v32  ;;  %v1670_v43 = vpack.c.bf16 %v829_v35, %v825_v33  ;;  %v585_v44 = vpop.f32.mrb[9].mxu0  ;;  %v746_v45 = vpop.f32.mrb[9].mxu1  ;;  %v584_v50 = vadd.f32 %v583_v40, %v387_v46  ;;  %v745_v51 = vadd.f32 %v744_v41, %v387_v46 }
  0xf8   : > { %v1636_v47 = vpack.c.bf16 %v828_v38, %v824_v36  ;;  %v1668_v48 = vpack.c.bf16 %v830_v39, %v826_v37  ;;  %v586_v52 = vadd.f32 %v585_v44, %v387_v46  ;;  %v747_v53 = vadd.f32 %v746_v45, %v387_v46  ;;  %v412_v46 = vpop.permute.xlu1 %411 }
  0xf9   : > { %v831_v62 = vmax.f32 %v584_v50, 0.0  ;;  %v833_v63 = vmax.f32 %v745_v51, 0.0 }
  0xfa   : > { %v589_v54 = vpop.f32.mrb[10].mxu0  ;;  %v750_v55 = vpop.f32.mrb[10].mxu1  ;;  %1637 = vmatprep.subr.bf16.mxu0 %v1636_v47  ;;  %1669 = vmatprep.subr.bf16.mxu1 %v1668_v48  ;;  %v832_v3 = vmax.f32 %v586_v52, 0.0  ;;  %v834_v4 = vmax.f32 %v747_v53, 0.0 }
  0xfb   : > { %v590_v56 = vadd.f32 %v589_v54, %v392_v49  ;;  %v751_v57 = vadd.f32 %v750_v55, %v392_v49  ;;  %v591_v58 = vpop.f32.mrb[11].mxu0  ;;  %v752_v59 = vpop.f32.mrb[11].mxu1  ;;  %1639 = vmatpush1.bf16.msra.mxu0 %v1638_v42  ;;  %1671 = vmatpush1.bf16.msra.mxu1 %v1670_v43 }
  0xfc   : > { %v592_v60 = vadd.f32 %v591_v58, %v392_v49  ;;  %v753_v61 = vadd.f32 %v752_v59, %v392_v49  ;;  %v407_v43 = vpop.permute.xlu0 %406 }
  0xfd   : > { %v835_v1 = vmax.f32 %v590_v56, 0.0  ;;  %v837_v2 = vmax.f32 %v751_v57, 0.0 }
  0xfe   : > { %v836_v5 = vmax.f32 %v592_v60, 0.0  ;;  %v838_v6 = vmax.f32 %v753_v61, 0.0  ;;  %v595_v7 = vpop.f32.mrb[12].mxu0  ;;  %v756_v8 = vpop.f32.mrb[12].mxu1 }
  0xff   : > { %v1642_v9 = vpack.c.bf16 %v835_v1, %v831_v62  ;;  %v1674_v10 = vpack.c.bf16 %v837_v2, %v833_v63  ;;  %v597_v11 = vpop.f32.mrb[13].mxu0  ;;  %v758_v12 = vpop.f32.mrb[13].mxu1  ;;  %v596_v17 = vadd.f32 %v595_v7, %v397_v13  ;;  %v757_v18 = vadd.f32 %v756_v8, %v397_v13 }
 0x100   : > { %v1640_v14 = vpack.c.bf16 %v836_v5, %v832_v3  ;;  %v1672_v15 = vpack.c.bf16 %v838_v6, %v834_v4  ;;  %v598_v19 = vadd.f32 %v597_v11, %v397_v13  ;;  %v759_v20 = vadd.f32 %v758_v12, %v397_v13  ;;  %v422_v13 = vpop.permute.xlu1 %421 }
 0x101   : > { %v839_v29 = vmax.f32 %v596_v17, 0.0  ;;  %v841_v30 = vmax.f32 %v757_v18, 0.0 }
 0x102   : > { %v601_v21 = vpop.f32.mrb[14].mxu0  ;;  %v762_v22 = vpop.f32.mrb[14].mxu1  ;;  %1641 = vmatprep.subr.bf16.mxu0 %v1640_v14  ;;  %1673 = vmatprep.subr.bf16.mxu1 %v1672_v15  ;;  %v840_v33 = vmax.f32 %v598_v19, 0.0  ;;  %v842_v34 = vmax.f32 %v759_v20, 0.0 }
 0x103   : > { %v602_v23 = vadd.f32 %v601_v21, %v402_v16  ;;  %v763_v24 = vadd.f32 %v762_v22, %v402_v16  ;;  %v603_v25 = vpop.f32.mrb[15].mxu0  ;;  %v764_v26 = vpop.f32.mrb[15].mxu1  ;;  %1643 = vmatpush1.bf16.msra.mxu0 %v1642_v9  ;;  %1675 = vmatpush1.bf16.msra.mxu1 %v1674_v10 }
 0x104   : > { %v604_v27 = vadd.f32 %v603_v25, %v402_v16  ;;  %v765_v28 = vadd.f32 %v764_v26, %v402_v16  ;;  %v417_v10 = vpop.permute.xlu0 %416 }
 0x105   : > { %v843_v31 = vmax.f32 %v602_v23, 0.0  ;;  %v845_v32 = vmax.f32 %v763_v24, 0.0 }
 0x106   : > { %v844_v35 = vmax.f32 %v604_v27, 0.0  ;;  %v846_v36 = vmax.f32 %v765_v28, 0.0  ;;  %v607_v37 = vpop.f32.mrb[16].mxu0  ;;  %v768_v38 = vpop.f32.mrb[16].mxu1 }
 0x107   : > { %v1646_v39 = vpack.c.bf16 %v843_v31, %v839_v29  ;;  %v1678_v40 = vpack.c.bf16 %v845_v32, %v841_v30  ;;  %v609_v41 = vpop.f32.mrb[17].mxu0  ;;  %v770_v42 = vpop.f32.mrb[17].mxu1  ;;  %v608_v47 = vadd.f32 %v607_v37, %v407_v43  ;;  %v769_v48 = vadd.f32 %v768_v38, %v407_v43 }
 0x108   : > { %v1644_v44 = vpack.c.bf16 %v844_v35, %v840_v33  ;;  %v1676_v45 = vpack.c.bf16 %v846_v36, %v842_v34  ;;  %v610_v49 = vadd.f32 %v609_v41, %v407_v43  ;;  %v771_v50 = vadd.f32 %v770_v42, %v407_v43  ;;  %v432_v43 = vpop.permute.xlu1 %431 }
 0x109   : > { %v847_v59 = vmax.f32 %v608_v47, 0.0  ;;  %v849_v60 = vmax.f32 %v769_v48, 0.0 }
 0x10a   : > { %v613_v51 = vpop.f32.mrb[18].mxu0  ;;  %v774_v52 = vpop.f32.mrb[18].mxu1  ;;  %1645 = vmatprep.subr.bf16.mxu0 %v1644_v44  ;;  %1677 = vmatprep.subr.bf16.mxu1 %v1676_v45  ;;  %v848_v63 = vmax.f32 %v610_v49, 0.0  ;;  %v850_v1 = vmax.f32 %v771_v50, 0.0 }
 0x10b   : > { %v614_v53 = vadd.f32 %v613_v51, %v412_v46  ;;  %v775_v54 = vadd.f32 %v774_v52, %v412_v46  ;;  %v615_v55 = vpop.f32.mrb[19].mxu0  ;;  %v776_v56 = vpop.f32.mrb[19].mxu1  ;;  %1647 = vmatpush1.bf16.msra.mxu0 %v1646_v39  ;;  %1679 = vmatpush1.bf16.msra.mxu1 %v1678_v40 }
 0x10c   : > { %v616_v57 = vadd.f32 %v615_v55, %v412_v46  ;;  %v777_v58 = vadd.f32 %v776_v56, %v412_v46  ;;  %v427_v40 = vpop.permute.xlu0 %426 }
 0x10d   : > { %v851_v61 = vmax.f32 %v614_v53, 0.0  ;;  %v853_v62 = vmax.f32 %v775_v54, 0.0 }
 0x10e   : > { %v852_v2 = vmax.f32 %v616_v57, 0.0  ;;  %v854_v3 = vmax.f32 %v777_v58, 0.0  ;;  %v619_v4 = vpop.f32.mrb[20].mxu0  ;;  %v780_v5 = vpop.f32.mrb[20].mxu1 }
 0x10f   : > { %v1650_v6 = vpack.c.bf16 %v851_v61, %v847_v59  ;;  %v1682_v7 = vpack.c.bf16 %v853_v62, %v849_v60  ;;  %v621_v8 = vpop.f32.mrb[21].mxu0  ;;  %v782_v9 = vpop.f32.mrb[21].mxu1  ;;  %v620_v14 = vadd.f32 %v619_v4, %v417_v10  ;;  %v781_v15 = vadd.f32 %v780_v5, %v417_v10 }
 0x110   : > { %v1648_v11 = vpack.c.bf16 %v852_v2, %v848_v63  ;;  %v1680_v12 = vpack.c.bf16 %v854_v3, %v850_v1  ;;  %v622_v16 = vadd.f32 %v621_v8, %v417_v10  ;;  %v783_v17 = vadd.f32 %v782_v9, %v417_v10  ;;  %v442_v10 = vpop.permute.xlu1 %441 }
 0x111   : > { %v855_v26 = vmax.f32 %v620_v14, 0.0  ;;  %v857_v27 = vmax.f32 %v781_v15, 0.0 }
 0x112   : > { %v625_v18 = vpop.f32.mrb[22].mxu0  ;;  %v786_v19 = vpop.f32.mrb[22].mxu1  ;;  %1649 = vmatprep.subr.bf16.mxu0 %v1648_v11  ;;  %1681 = vmatprep.subr.bf16.mxu1 %v1680_v12  ;;  %v856_v30 = vmax.f32 %v622_v16, 0.0  ;;  %v858_v31 = vmax.f32 %v783_v17, 0.0 }
 0x113   : > { %v626_v20 = vadd.f32 %v625_v18, %v422_v13  ;;  %v787_v21 = vadd.f32 %v786_v19, %v422_v13  ;;  %v627_v22 = vpop.f32.mrb[23].mxu0  ;;  %v788_v23 = vpop.f32.mrb[23].mxu1  ;;  %1651 = vmatpush1.bf16.msra.mxu0 %v1650_v6  ;;  %1683 = vmatpush1.bf16.msra.mxu1 %v1682_v7 }
 0x114   : > { %v628_v24 = vadd.f32 %v627_v22, %v422_v13  ;;  %v789_v25 = vadd.f32 %v788_v23, %v422_v13  ;;  %v437_v7 = vpop.permute.xlu0 %436 }
 0x115   : > { %v859_v28 = vmax.f32 %v626_v20, 0.0  ;;  %v861_v29 = vmax.f32 %v787_v21, 0.0 }
 0x116   : > { %v860_v32 = vmax.f32 %v628_v24, 0.0  ;;  %v862_v33 = vmax.f32 %v789_v25, 0.0  ;;  %v631_v34 = vpop.f32.mrb[24].mxu0  ;;  %v792_v35 = vpop.f32.mrb[24].mxu1 }
 0x117   : > { %v1654_v36 = vpack.c.bf16 %v859_v28, %v855_v26  ;;  %v1686_v37 = vpack.c.bf16 %v861_v29, %v857_v27  ;;  %v633_v38 = vpop.f32.mrb[25].mxu0  ;;  %v794_v39 = vpop.f32.mrb[25].mxu1  ;;  %v632_v44 = vadd.f32 %v631_v34, %v427_v40  ;;  %v793_v45 = vadd.f32 %v792_v35, %v427_v40  ;;  %v879_v35 = vld [vmem:[%s2093_s4] sm:$0xff] }
 0x118   : > { %v1652_v41 = vpack.c.bf16 %v860_v32, %v856_v30  ;;  %v1684_v42 = vpack.c.bf16 %v862_v33, %v858_v31  ;;  %v634_v46 = vadd.f32 %v633_v38, %v427_v40  ;;  %v795_v47 = vadd.f32 %v794_v39, %v427_v40  ;;  %v882_v38 = vld [vmem:[%s2093_s4 + $0x18] sm:$0xff]  ;;  %v883_v39 = vld [vmem:[%s2093_s4 + $0x20] sm:$0xff]  ;;  %v884_v40 = vld [vmem:[%s2093_s4 + $0x28] sm:$0xff] }
 0x119   : > { %v863_v56 = vmax.f32 %v632_v44, 0.0  ;;  %v865_v57 = vmax.f32 %v793_v45, 0.0 }
 0x11a   : > { %v637_v48 = vpop.f32.mrb[26].mxu0  ;;  %v798_v49 = vpop.f32.mrb[26].mxu1  ;;  %1653 = vmatprep.subr.bf16.mxu0 %v1652_v41  ;;  %1685 = vmatprep.subr.bf16.mxu1 %v1684_v42  ;;  %v864_v60 = vmax.f32 %v634_v46, 0.0  ;;  %v866_v61 = vmax.f32 %v795_v47, 0.0  ;;  %v885_v41 = vld [vmem:[%s2093_s4 + $0x30] sm:$0xff]  ;;  %v886_v42 = vld [vmem:[%s2093_s4 + $0x38] sm:$0xff] }
 0x11b   : > { %v638_v50 = vadd.f32 %v637_v48, %v432_v43  ;;  %v799_v51 = vadd.f32 %v798_v49, %v432_v43  ;;  %v639_v52 = vpop.f32.mrb[27].mxu0  ;;  %v800_v53 = vpop.f32.mrb[27].mxu1  ;;  %1655 = vmatpush1.bf16.msra.mxu0 %v1654_v36  ;;  %1687 = vmatpush1.bf16.msra.mxu1 %v1686_v37  ;;  %v880_v36 = vld [vmem:[%s2093_s4 + $0x8] sm:$0xff]  ;;  %v881_v37 = vld [vmem:[%s2093_s4 + $0x10] sm:$0xff] }
 0x11c   : > { %v640_v54 = vadd.f32 %v639_v52, %v432_v43  ;;  %v801_v55 = vadd.f32 %v800_v53, %v432_v43  ;;  %v898_v47 = vpop.permute.xlu0 %897  ;;  %v903_v48 = vpop.permute.xlu1 %902 }
 0x11d   : > { %v867_v58 = vmax.f32 %v638_v50, 0.0  ;;  %v869_v59 = vmax.f32 %v799_v51, 0.0 }
 0x11e   : > { %v868_v62 = vmax.f32 %v640_v54, 0.0  ;;  %v870_v63 = vmax.f32 %v801_v55, 0.0  ;;  %v643_v1 = vpop.f32.mrb[28].mxu0  ;;  %v804_v2 = vpop.f32.mrb[28].mxu1 }
 0x11f   : > { %v1658_v3 = vpack.c.bf16 %v867_v58, %v863_v56  ;;  %v1690_v4 = vpack.c.bf16 %v869_v59, %v865_v57  ;;  %v645_v5 = vpop.f32.mrb[29].mxu0  ;;  %v806_v6 = vpop.f32.mrb[29].mxu1  ;;  %v644_v11 = vadd.f32 %v643_v1, %v437_v7  ;;  %v805_v12 = vadd.f32 %v804_v2, %v437_v7 }
 0x120   : > { %v1656_v8 = vpack.c.bf16 %v868_v62, %v864_v60  ;;  %v1688_v9 = vpack.c.bf16 %v870_v63, %v866_v61  ;;  %v646_v13 = vadd.f32 %v645_v5, %v437_v7  ;;  %v807_v14 = vadd.f32 %v806_v6, %v437_v7 }
 0x121   : > { %v871_v23 = vmax.f32 %v644_v11, 0.0  ;;  %v873_v24 = vmax.f32 %v805_v12, 0.0  ;;  %v908_v11 = vpop.permute.xlu0 %907 }
 0x122   : > { %v649_v15 = vpop.f32.mrb[30].mxu0  ;;  %v810_v16 = vpop.f32.mrb[30].mxu1  ;;  %1657 = vmatprep.subr.bf16.mxu0 %v1656_v8  ;;  %1689 = vmatprep.subr.bf16.mxu1 %v1688_v9  ;;  %v872_v27 = vmax.f32 %v646_v13, 0.0  ;;  %v874_v28 = vmax.f32 %v807_v14, 0.0 }
 0x123   : > { %v650_v17 = vadd.f32 %v649_v15, %v442_v10  ;;  %v811_v18 = vadd.f32 %v810_v16, %v442_v10  ;;  %v651_v19 = vpop.f32.mrb[31].mxu0  ;;  %v812_v20 = vpop.f32.mrb[31].mxu1  ;;  %1659 = vmatpush1.bf16.msra.mxu0 %v1658_v3  ;;  %1691 = vmatpush1.bf16.msra.mxu1 %v1690_v4 }
 0x124   : > { %v652_v21 = vadd.f32 %v651_v19, %v442_v10  ;;  %v813_v22 = vadd.f32 %v812_v20, %v442_v10  ;;  %v913_v14 = vpop.permute.xlu1 %912 }
 0x125   : > { %v875_v25 = vmax.f32 %v650_v17, 0.0  ;;  %v877_v26 = vmax.f32 %v811_v18, 0.0 }
 0x126   : > { %v876_v29 = vmax.f32 %v652_v21, 0.0  ;;  %v878_v30 = vmax.f32 %v813_v22, 0.0 }
 0x127   : > { %v1662_v31 = vpack.c.bf16 %v875_v25, %v871_v23  ;;  %v1694_v32 = vpack.c.bf16 %v877_v26, %v873_v24 }
 0x128   : > { %v1660_v33 = vpack.c.bf16 %v876_v29, %v872_v27  ;;  %v1692_v34 = vpack.c.bf16 %v878_v30, %v874_v28 }
 0x12a   : > { %1661 = vmatprep.subr.bf16.mxu0 %v1660_v33  ;;  %1693 = vmatprep.subr.bf16.mxu1 %v1692_v34 }
 0x12b   : > { %1663 = vmatpush1.bf16.msra.mxu0 %v1662_v31  ;;  %1695 = vmatpush1.bf16.msra.mxu1 %v1694_v32 }
 0x12e   : > { %1000 = vmatmul.mubr.f32.vlgmr.msra.gmra.mrb[32].mxu0 %v879_v35  ;;  %1113 = vmatmul.mubr.f32.vlgmr.msra.gmra.mrb[32].mxu1 %v879_v35 }
 0x12f   : > { %1005 = vmatprep.mubr.f32.mxu0 %v1757_v0  ;;  %1118 = vmatprep.mubr.f32.mxu1 %v1757_v0 }
 0x132   : > { %1006 = vmatmul.mubr.f32.gmra.mrb[34].mxu0 %v880_v36  ;;  %1119 = vmatmul.mubr.f32.gmra.mrb[34].mxu1 %v880_v36 }
 0x133   : > { %1011 = vmatprep.mubr.f32.mxu0 %v1757_v0  ;;  %1124 = vmatprep.mubr.f32.mxu1 %v1757_v0 }
 0x136   : > { %1012 = vmatmul.mubr.f32.gmra.mrb[36].mxu0 %v881_v37  ;;  %1125 = vmatmul.mubr.f32.gmra.mrb[36].mxu1 %v881_v37 }
 0x137   : > { %1017 = vmatprep.mubr.f32.mxu0 %v1757_v0  ;;  %1130 = vmatprep.mubr.f32.mxu1 %v1757_v0 }
 0x13a   : > { %1018 = vmatmul.mubr.f32.gmra.mrb[38].mxu0 %v882_v38  ;;  %1131 = vmatmul.mubr.f32.gmra.mrb[38].mxu1 %v882_v38 }
 0x13b   : > { %1023 = vmatprep.mubr.f32.mxu0 %v1757_v0  ;;  %1136 = vmatprep.mubr.f32.mxu1 %v1757_v0 }
 0x13e   : > { %1024 = vmatmul.mubr.f32.gmra.mrb[40].mxu0 %v883_v39  ;;  %1137 = vmatmul.mubr.f32.gmra.mrb[40].mxu1 %v883_v39 }
 0x13f   : > { %1029 = vmatprep.mubr.f32.mxu0 %v1757_v0  ;;  %1142 = vmatprep.mubr.f32.mxu1 %v1757_v0 }
 0x142   : > { %1030 = vmatmul.mubr.f32.gmra.mrb[42].mxu0 %v884_v40  ;;  %1143 = vmatmul.mubr.f32.gmra.mrb[42].mxu1 %v884_v40 }
 0x143   : > { %1035 = vmatprep.mubr.f32.mxu0 %v1757_v0  ;;  %1148 = vmatprep.mubr.f32.mxu1 %v1757_v0 }
 0x146   : > { %1036 = vmatmul.mubr.f32.gmra.mrb[44].mxu0 %v885_v41  ;;  %1149 = vmatmul.mubr.f32.gmra.mrb[44].mxu1 %v885_v41  ;;  %v918_v41 = vpop.permute.xlu0 %917 }
 0x147   : > { %1041 = vmatprep.mubr.f32.mxu0 %v1757_v0  ;;  %1154 = vmatprep.mubr.f32.mxu1 %v1757_v0 }
 0x14a   : > { %1042 = vmatmul.mubr.f32.gmra.mrb[46].mxu0 %v886_v42  ;;  %1155 = vmatmul.mubr.f32.gmra.mrb[46].mxu1 %v886_v42 }
 0x14b   : > { %1268 = vmatprep.mubr.f32.mxu0 %v1757_v0  ;;  %1339 = vmatprep.mubr.f32.mxu1 %v1757_v0 }
 0x201   : > { %v1001_v43 = vpop.f32.mrb[32].mxu0  ;;  %v1114_v44 = vpop.f32.mrb[32].mxu1 }
 0x202   : > { %v1003_v45 = vpop.f32.mrb[33].mxu0  ;;  %v1116_v46 = vpop.f32.mrb[33].mxu1  ;;  %v1002_v49 = vadd.f32 %v1001_v43, %v898_v47  ;;  %v1115_v50 = vadd.f32 %v1114_v44, %v898_v47 }
 0x203   : > { %v1004_v51 = vadd.f32 %v1003_v45, %v898_v47  ;;  %v1117_v52 = vadd.f32 %v1116_v46, %v898_v47  ;;  %v923_v44 = vpop.permute.xlu1 %922 }
 0x204   : > { %v1161_v61 = vmax.f32 %v1002_v49, 0.0  ;;  %v1163_v0 = vmax.f32 %v1115_v50, 0.0 }
 0x205   : > { %v1007_v53 = vpop.f32.mrb[34].mxu0  ;;  %v1120_v54 = vpop.f32.mrb[34].mxu1  ;;  %v1162_v1 = vmax.f32 %v1004_v51, 0.0  ;;  %v1164_v2 = vmax.f32 %v1117_v52, 0.0 }
 0x206   : > { %v1008_v55 = vadd.f32 %v1007_v53, %v903_v48  ;;  %v1121_v56 = vadd.f32 %v1120_v54, %v903_v48  ;;  %v1009_v57 = vpop.f32.mrb[35].mxu0  ;;  %v1122_v58 = vpop.f32.mrb[35].mxu1 }
 0x207   : > { %v1010_v59 = vadd.f32 %v1009_v57, %v903_v48  ;;  %v1123_v60 = vadd.f32 %v1122_v58, %v903_v48 }
 0x208   : > { %v1165_v62 = vmax.f32 %v1008_v55, 0.0  ;;  %v1167_v63 = vmax.f32 %v1121_v56, 0.0 }
 0x209   : > { %v1166_v3 = vmax.f32 %v1010_v59, 0.0  ;;  %v1168_v4 = vmax.f32 %v1123_v60, 0.0  ;;  %v1013_v5 = vpop.f32.mrb[36].mxu0  ;;  %v1126_v6 = vpop.f32.mrb[36].mxu1 }
 0x20a   : > { %v1698_v7 = vpack.c.bf16 %v1165_v62, %v1161_v61  ;;  %v1714_v8 = vpack.c.bf16 %v1167_v63, %v1163_v0  ;;  %v1015_v9 = vpop.f32.mrb[37].mxu0  ;;  %v1128_v10 = vpop.f32.mrb[37].mxu1  ;;  %v1014_v15 = vadd.f32 %v1013_v5, %v908_v11  ;;  %v1127_v16 = vadd.f32 %v1126_v6, %v908_v11 }
 0x20b   : > { %v1696_v12 = vpack.c.bf16 %v1166_v3, %v1162_v1  ;;  %v1712_v13 = vpack.c.bf16 %v1168_v4, %v1164_v2  ;;  %v1016_v17 = vadd.f32 %v1015_v9, %v908_v11  ;;  %v1129_v18 = vadd.f32 %v1128_v10, %v908_v11  ;;  %v933_v10 = vpop.permute.xlu1 %932 }
 0x20c   : > { %v1169_v27 = vmax.f32 %v1014_v15, 0.0  ;;  %v1171_v28 = vmax.f32 %v1127_v16, 0.0 }
 0x20d   : > { %v1019_v19 = vpop.f32.mrb[38].mxu0  ;;  %v1132_v20 = vpop.f32.mrb[38].mxu1  ;;  %1697 = vmatprep.subr.bf16.mxu0 %v1696_v12  ;;  %1713 = vmatprep.subr.bf16.mxu1 %v1712_v13  ;;  %v1170_v31 = vmax.f32 %v1016_v17, 0.0  ;;  %v1172_v32 = vmax.f32 %v1129_v18, 0.0 }
 0x20e   : > { %v1020_v21 = vadd.f32 %v1019_v19, %v913_v14  ;;  %v1133_v22 = vadd.f32 %v1132_v20, %v913_v14  ;;  %v1021_v23 = vpop.f32.mrb[39].mxu0  ;;  %v1134_v24 = vpop.f32.mrb[39].mxu1  ;;  %1699 = vmatpush1.bf16.msra.mxu0 %v1698_v7  ;;  %1715 = vmatpush1.bf16.msra.mxu1 %v1714_v8 }
 0x20f   : > { %v1022_v25 = vadd.f32 %v1021_v23, %v913_v14  ;;  %v1135_v26 = vadd.f32 %v1134_v24, %v913_v14  ;;  %v928_v7 = vpop.permute.xlu0 %927 }
 0x210   : > { %v1173_v29 = vmax.f32 %v1020_v21, 0.0  ;;  %v1175_v30 = vmax.f32 %v1133_v22, 0.0 }
 0x211   : > { %v1174_v33 = vmax.f32 %v1022_v25, 0.0  ;;  %v1176_v34 = vmax.f32 %v1135_v26, 0.0  ;;  %v1025_v35 = vpop.f32.mrb[40].mxu0  ;;  %v1138_v36 = vpop.f32.mrb[40].mxu1 }
 0x212   : > { %v1702_v37 = vpack.c.bf16 %v1173_v29, %v1169_v27  ;;  %v1718_v38 = vpack.c.bf16 %v1175_v30, %v1171_v28  ;;  %v1027_v39 = vpop.f32.mrb[41].mxu0  ;;  %v1140_v40 = vpop.f32.mrb[41].mxu1  ;;  %v1026_v45 = vadd.f32 %v1025_v35, %v918_v41  ;;  %v1139_v46 = vadd.f32 %v1138_v36, %v918_v41  ;;  %v1193_v35 = vld [vmem:[%s2095_s6] sm:$0xff] }
 0x213   : > { %v1700_v42 = vpack.c.bf16 %v1174_v33, %v1170_v31  ;;  %v1716_v43 = vpack.c.bf16 %v1176_v34, %v1172_v32  ;;  %v1028_v47 = vadd.f32 %v1027_v39, %v918_v41  ;;  %v1141_v48 = vadd.f32 %v1140_v40, %v918_v41  ;;  %v1198_v41 = vpop.permute.xlu0 %1197 }
 0x214   : > { %v1177_v57 = vmax.f32 %v1026_v45, 0.0  ;;  %v1179_v58 = vmax.f32 %v1139_v46, 0.0  ;;  %v1759_v36 = vmov 1966171168  }
 0x215   : > { %v1031_v49 = vpop.f32.mrb[42].mxu0  ;;  %v1144_v50 = vpop.f32.mrb[42].mxu1  ;;  %1701 = vmatprep.subr.bf16.mxu0 %v1700_v42  ;;  %1717 = vmatprep.subr.bf16.mxu1 %v1716_v43  ;;  %v1178_v61 = vmax.f32 %v1028_v47, 0.0  ;;  %v1180_v0 = vmax.f32 %v1141_v48, 0.0 }
 0x216   : > { %v1032_v51 = vadd.f32 %v1031_v49, %v923_v44  ;;  %v1145_v52 = vadd.f32 %v1144_v50, %v923_v44  ;;  %v1033_v53 = vpop.f32.mrb[43].mxu0  ;;  %v1146_v54 = vpop.f32.mrb[43].mxu1  ;;  %1703 = vmatpush1.bf16.msra.mxu0 %v1702_v37  ;;  %1719 = vmatpush1.bf16.msra.mxu1 %v1718_v38  ;;  %v1399_v37 = vunpack.c.l.s4 %v1759_v36  ;;  %v1401_v38 = vlaneseq }
 0x217   : > { %v1034_v55 = vadd.f32 %v1033_v53, %v923_v44  ;;  %v1147_v56 = vadd.f32 %v1146_v54, %v923_v44 }
 0x218   : > { %v1181_v59 = vmax.f32 %v1032_v51, 0.0  ;;  %v1183_v60 = vmax.f32 %v1145_v52, 0.0  ;;  %v1400_v39 = vunpack.c.0.s8 %v1399_v37  ;;  %v1402_v40 = vshrl.u32 %v1401_v38, 7 }
 0x219   : > { %v1182_v62 = vmax.f32 %v1034_v55, 0.0  ;;  %v1184_v63 = vmax.f32 %v1147_v56, 0.0  ;;  %v1037_v1 = vpop.f32.mrb[44].mxu0  ;;  %v1150_v2 = vpop.f32.mrb[44].mxu1  ;;  %vm2075_vm3 = vcmp.lt.s32.totalorder %v1401_v38, 512 }
 0x21a   : > { %v1706_v3 = vpack.c.bf16 %v1181_v59, %v1177_v57  ;;  %v1722_v4 = vpack.c.bf16 %v1183_v60, %v1179_v58  ;;  %v1039_v5 = vpop.f32.mrb[45].mxu0  ;;  %v1152_v6 = vpop.f32.mrb[45].mxu1  ;;  %v1038_v11 = vadd.f32 %v1037_v1, %v928_v7  ;;  %v1151_v12 = vadd.f32 %v1150_v2, %v928_v7 }
 0x21b   : > { %v1704_v8 = vpack.c.bf16 %v1182_v62, %v1178_v61  ;;  %v1720_v9 = vpack.c.bf16 %v1184_v63, %v1180_v0  ;;  %v1040_v13 = vadd.f32 %v1039_v5, %v928_v7  ;;  %v1153_v14 = vadd.f32 %v1152_v6, %v928_v7 }
 0x21c   : > { %v1185_v23 = vmax.f32 %v1038_v11, 0.0  ;;  %v1187_v24 = vmax.f32 %v1151_v12, 0.0  ;;  %v2052_v49 = vsub.s32 %v1400_v39, %v1402_v40 }
 0x21d   : > { %v1043_v15 = vpop.f32.mrb[46].mxu0  ;;  %v1156_v16 = vpop.f32.mrb[46].mxu1  ;;  %1705 = vmatprep.subr.bf16.mxu0 %v1704_v8  ;;  %1721 = vmatprep.subr.bf16.mxu1 %v1720_v9  ;;  %v1186_v27 = vmax.f32 %v1040_v13, 0.0  ;;  %v1188_v28 = vmax.f32 %v1153_v14, 0.0 }
 0x21e   : > { %v1044_v17 = vadd.f32 %v1043_v15, %v933_v10  ;;  %v1157_v18 = vadd.f32 %v1156_v16, %v933_v10  ;;  %v1045_v19 = vpop.f32.mrb[47].mxu0  ;;  %v1158_v20 = vpop.f32.mrb[47].mxu1  ;;  %1707 = vmatpush1.bf16.msra.mxu0 %v1706_v3  ;;  %1723 = vmatpush1.bf16.msra.mxu1 %v1722_v4 }
 0x21f   : > { %v1046_v21 = vadd.f32 %v1045_v19, %v933_v10  ;;  %v1159_v22 = vadd.f32 %v1158_v20, %v933_v10 }
 0x220   : > { %v1189_v25 = vmax.f32 %v1044_v17, 0.0  ;;  %v1191_v26 = vmax.f32 %v1157_v18, 0.0 }
 0x221   : > { %v1190_v29 = vmax.f32 %v1046_v21, 0.0  ;;  %v1192_v30 = vmax.f32 %v1159_v22, 0.0 }
 0x222   : > { %v1710_v31 = vpack.c.bf16 %v1189_v25, %v1185_v23  ;;  %v1726_v32 = vpack.c.bf16 %v1191_v26, %v1187_v24  ;;  %v1391_v23 = vld [vmem:[%s314_s14] sm:$0xf] }
 0x223   : > { %v1708_v33 = vpack.c.bf16 %v1190_v29, %v1186_v27  ;;  %v1724_v34 = vpack.c.bf16 %v1192_v30, %v1188_v28 }
 0x225   : > { %1709 = vmatprep.subr.bf16.mxu0 %v1708_v33  ;;  %1725 = vmatprep.subr.bf16.mxu1 %v1724_v34 }
 0x226   : > { %1711 = vmatpush1.bf16.msra.mxu0 %v1710_v31  ;;  %1727 = vmatpush1.bf16.msra.mxu1 %v1726_v32 }
 0x229   : > { %1627 = vmatmul.mubr.msk.f32.vlgmr.msra.gmra.mrb[48].mxu0 %vm1200_vm1, %v1193_v35  ;;  %1628 = vmatmul.mubr.msk.f32.vlgmr.msra.gmra.mrb[48].mxu1 %vm1200_vm1, %v1193_v35 }
 0x2fc   : > { %v1270_v42 = vpop.f32.mrb[48].mxu0  ;;  %v1341_v43 = vpop.f32.mrb[48].mxu1 }
 0x2fd   : > { %v1271_v44 = vadd.f32 %v1270_v42, %v1198_v41  ;;  %v1342_v45 = vadd.f32 %v1341_v43, %v1198_v41  ;;  %v1272_v46 = vpop.f32.mrb[49].mxu0  ;;  %v1343_v47 = vpop.f32.mrb[49].mxu1 }
 0x2fe   : > { %v1273_v48 = vadd.f32 %v1272_v46, %v1198_v41  ;;  %v1344_v50 = vadd.f32 %v1343_v47, %v1198_v41 }
 0x2ff   : > { %v1346_v51 = vsub.f32 0.0, %v1271_v44  ;;  %v1359_v52 = vsel %vm1358_vm2, %v1271_v44, 0.0  ;;  %v1348_v53 = vsub.f32 0.0, %v1342_v45  ;;  %v1373_v54 = vsel %vm1358_vm2, %v1342_v45, 0.0 }
 0x300   : > { %v1360_v55 = vrot.slane %v1359_v52, 4  ;;  %v1374_v56 = vrot.slane %v1373_v54, 4  ;;  %v1347_v57 = vsub.f32 0.0, %v1273_v48  ;;  %v1366_v58 = vsel %vm1358_vm2, %v1273_v48, 0.0 }
 0x301   : > { %v1350_v59 = vmul.f32 1.442695, %v1346_v51  ;;  %v1354_v60 = vmul.f32 1.442695, %v1348_v53  ;;  %v1367_v61 = vrot.slane %v1366_v58, 4  ;;  %v1396_v0 = vcombine.high %v1271_v44, %v1273_v48 }
 0x302   : > { %v1361_v62 = vadd.f32 %v1360_v55, %v1359_v52  ;;  %v1375_v63 = vadd.f32 %v1374_v56, %v1373_v54  ;;  %v1352_v1 = vmul.f32 1.442695, %v1347_v57  ;;  %v1349_v2 = vsub.f32 0.0, %v1344_v50 }
 0x303   : > { %1741 = vpow2.f32 %v1350_v59  ;;  %v1368_v3 = vadd.f32 %v1367_v61, %v1366_v58  ;;  %v1404_v4 = vrot.slane %v1396_v0, %v2052_v49  ;;  %v1380_v5 = vsel %vm1358_vm2, %v1344_v50, 0.0 }
 0x304   : > { %v1362_v6 = vrot.slane %v1361_v62, 2  ;;  %1743 = vpow2.f32 %v1354_v60  ;;  %v1376_v7 = vrot.slane %v1375_v63, 2  ;;  %v1356_v8 = vmul.f32 1.442695, %v1349_v2 }
 0x305   : > { %1745 = vpow2.f32 %v1352_v1  ;;  %v1369_v9 = vrot.slane %v1368_v3, 2  ;;  %v1381_v10 = vrot.slane %v1380_v5, 4  ;;  %v1397_v11 = vcombine.high %v1342_v45, %v1344_v50 }
 0x306   : > { %v1363_v12 = vadd.f32 %v1362_v6, %v1361_v62  ;;  %v1377_v13 = vadd.f32 %v1376_v7, %v1375_v63  ;;  %1747 = vpow2.f32 %v1356_v8 }
 0x307   : > { %v1370_v14 = vadd.f32 %v1369_v9, %v1368_v3  ;;  %v1382_v15 = vadd.f32 %v1381_v10, %v1380_v5  ;;  %v1411_v16 = vrot.slane %v1397_v11, %v2052_v49 }
 0x308   : > { %v1364_v17 = vrot.slane %v1363_v12, 1  ;;  %v1378_v18 = vrot.slane %v1377_v13, 1 }
 0x309   : > { %v1371_v19 = vrot.slane %v1370_v14, 1  ;;  %v1383_v20 = vrot.slane %v1382_v15, 2  ;;  %v1412_v21 = vcombine.low %v1404_v4, %v1411_v16  ;;  %v1452_v22 = vcombine.high %v1404_v4, %v1411_v16 }
 0x30a   : > { %v1365_v24 = vadd.f32 %v1364_v17, %v1363_v12  ;;  %v1379_v25 = vadd.f32 %v1378_v18, %v1377_v13 }
 0x30b   : > { %v1372_v26 = vadd.f32 %v1371_v19, %v1370_v14  ;;  %v1384_v27 = vadd.f32 %v1383_v20, %v1382_v15  ;;  %v1419_v28 = vrot.slane %v1412_v21, %v2052_v49  ;;  %v1459_v56 = vrot.slane %v1452_v22, %v2052_v49 }
 0x30c   : > { %v1387_v29 = vsub.f32 0.0, %v1365_v24  ;;  %v1389_v36 = vsub.f32 0.0, %v1379_v25 }
 0x30d   : > { %v1742_v30 = vpop.eup %1741  ;;  %v1388_v31 = vsub.f32 0.0, %v1372_v26  ;;  %v1385_v32 = vrot.slane %v1384_v27, 1  ;;  %v1421_v33 = vsub.f32 %v1391_v23, %v1419_v28  ;;  %v1472_v61 = vcombine.high %v1419_v28, %v1419_v28 }
 0x30e   : > { %v1744_v34 = vpop.eup %1743  ;;  %v1478_v38 = vcombine.high %v1459_v56, %v1459_v56 }
 0x30f   : > { %v1746_v35 = vpop.eup %1745  ;;  %v1493_v37 = vcombine.low %v1387_v29, %v1388_v31  ;;  %v1386_v39 = vadd.f32 %v1385_v32, %v1384_v27 }
 0x310   : > { %v1748_v40 = vpop.eup %1747  ;;  %v1426_v41 = vcombine.low %v1742_v30, %v1746_v35 }
 0x311   : > { %v1390_v42 = vsub.f32 0.0, %v1386_v39  ;;  %v1427_v43 = vcombine.low %v1744_v34, %v1748_v40  ;;  %v1501_v45 = vrot.slane %v1493_v37, %v2052_v49 }
 0x312   : > { %v1434_v44 = vrot.slane %v1426_v41, %v2052_v49 }
 0x313   : > { %v1441_v46 = vrot.slane %v1427_v43, %v2052_v49  ;;  %v1494_v47 = vcombine.low %v1389_v36, %v1390_v42 }
 0x315   : > { %v1442_v48 = vcombine.low %v1434_v44, %v1441_v46  ;;  %v1462_v50 = vcombine.high %v1434_v44, %v1441_v46  ;;  %v1508_v51 = vrot.slane %v1494_v47, %v2052_v49 }
 0x317   : > { %v1449_v52 = vrot.slane %v1442_v48, %v2052_v49  ;;  %v1509_v53 = vcombine.low %v1501_v45, %v1508_v51  ;;  %v1469_v59 = vrot.slane %v1462_v50, %v2052_v49 }
 0x319   : > { %v1451_v55 = vmul.f32 %v1449_v52, %v1421_v33  ;;  %v1516_v57 = vrot.slane %v1509_v53, %v2052_v49  ;;  %v1475_v62 = vcombine.high %v1449_v52, %v1449_v52  ;;  %v1481_v2 = vcombine.high %v1469_v59, %v1469_v59 }
 0x31b   : > { %v1461_v58 = vsub.f32 %v1451_v55, %v1459_v56  ;;  %1629 = vst.msk [vmem:[%s326_s18 + $0x1] ss:$2 sm:$0xf] %vm2075_vm3, %v1516_v57 }
 0x31d   : > { %v1471_v60 = vmul.f32 %v1469_v59, %v1461_v58 }
 0x31f   : > { %v1474_v0 = vsub.f32 %v1471_v60, %v1472_v61 }
 0x321   : > { %v1477_v63 = vmul.f32 %v1475_v62, %v1474_v0 }
 0x323   : > { %v1480_v1 = vsub.f32 %v1477_v63, %v1478_v38 }
 0x325   : > { %v1483_v3 = vmul.f32 %v1481_v2, %v1480_v1 }
 0x327   : > { %1488 = vst.msk [vmem:[%s326_s18] ss:$2 sm:$0xf] %vm2075_vm3, %v1483_v3 }
 0x328 PF: > { %s18_s27 = sadd.s32 1, %s1755_s27  }
 0x329   : > { %p15_p4 = scmp.ge.s32.totalorder %s18_s27, 4  }
 0x32b   :  { %17 = sbr.rel (!%p15_p4) target bundleno = 1 (0x1), region = 86 }

</bundles_post_ra>
